<compile_context>
chip_gen: v6e
topology: v6e:2x2x1
jax: 0.10.0
libtpu: 0.0.40
codegen_flags: <defaults>
</compile_context>

<pallas_src>
import jax
import jax.numpy as jnp
from jax.experimental import pallas as pl
from jax.experimental.pallas import tpu as pltpu

H1, H2 = 128, 64          # hidden sizes fixed by the module
BN_EPS = 1e-5             # torch BatchNorm1d default eps
LANE = 128                # lane width: output columns padded to a multiple
ALIGN_B = 16              # batch-tile row alignment (bf16 sublane pair)


def mlp_kernel(x_ref, w1_ref, b1_ref, w2_ref, b2_ref, w3_ref, b3_ref, out_ref):
    # x/w* are bf16; dots accumulate in f32; bias + ReLU in f32.
    x = x_ref[...]
    h1 = jnp.dot(x, w1_ref[...], preferred_element_type=jnp.float32) + b1_ref[...]
    h1 = jnp.maximum(h1, 0.0).astype(w2_ref.dtype)
    h2 = jnp.dot(h1, w2_ref[...], preferred_element_type=jnp.float32) + b2_ref[...]
    h2 = jnp.maximum(h2, 0.0).astype(w3_ref.dtype)
    out_ref[...] = (jnp.dot(h2, w3_ref[...], preferred_element_type=jnp.float32)
                    + b3_ref[...]).astype(out_ref.dtype)


def _round_up(n, m):
    return ((n + m - 1) // m) * m


def _fold_bn(w, b, gamma, beta, mean, var, eps=BN_EPS):
    """Fold eval-mode BatchNorm1d into the preceding Linear (w is (in, out))."""
    s = gamma / jnp.sqrt(var + eps)
    return w * s[None, :], (b - mean) * s + beta


def simplified_cnn_path(x, params, *, block_b=512):
    """Forward of SimplifiedCNNPath (inference).  x: (B, D) f32 -> (B, C) f32."""
    (w1, b1, g1, be1, m1, v1,
     w2, b2, g2, be2, m2, v2,
     w3, b3) = params

    B, D = x.shape
    C = w3.shape[1]
    assert w1.shape == (D, H1) and w2.shape == (H1, H2) and w3.shape[0] == H2

    # Fold BatchNorm (eval) into the linears; Dropout (eval) is the identity.
    w1f, b1f = _fold_bn(w1, b1, g1, be1, m1, v1)
    w2f, b2f = _fold_bn(w2, b2, g2, be2, m2, v2)

    # Lane-dense output: pad classifier columns (zeros) to a multiple of 128.
    Cp = _round_up(max(C, 1), LANE)
    w3p = jnp.pad(w3, ((0, 0), (0, Cp - C)))
    b3p = jnp.pad(b3, ((0, Cp - C),))

    # bf16 activations / weights (f32 accumulation in-kernel), f32 biases.
    bf16 = jnp.bfloat16
    x_b = x.astype(bf16)
    w1b, w2b, w3b = w1f.astype(bf16), w2f.astype(bf16), w3p.astype(bf16)
    b1f, b2f, b3p = (b1f.astype(jnp.float32), b2f.astype(jnp.float32),
                     b3p.astype(jnp.float32))

    # --- batch tile sizing --------------------------------------------------
    # Target >= 2 grid steps (v7x megacore sharding), 16-row aligned.
    TB = min(block_b, _round_up(max(1, -(-B // 2)), ALIGN_B))
    TB = max(TB, ALIGN_B)
    # Cap by a conservative VMEM working-set budget (double-buffered blocks).
    ELEM_W = 2  # bf16
    fixed_bytes = (2 * (D * H1 + H1 * H2 + H2 * Cp) * ELEM_W   # resident weights
                   + 2 * (H1 + H2 + Cp) * 4)                   # resident biases
    per_row_bytes = 2 * D * ELEM_W + 2 * Cp * 4                # x + out, dbuf
    budget = 40 << 20
    tb_cap = max(ALIGN_B,
                 ((budget - fixed_bytes) // max(per_row_bytes, 1))
                 // ALIGN_B * ALIGN_B)
    TB = min(TB, tb_cap)

    Bp = _round_up(B, TB)
    xp = x_b if Bp == B else jnp.pad(x_b, ((0, Bp - B), (0, 0)))
    grid = (Bp // TB,)

    # Explicit scoped-VMEM limit from the actual block sizes (+ intermediates).
    interm_bytes = 2 * TB * (H1 + H2) * 4
    vmem_bytes = fixed_bytes + TB * per_row_bytes + interm_bytes + (2 << 20)
    vmem_limit = int(min(100 << 20, max(vmem_bytes, 16 << 20)))

    def row_spec(cols):
        return pl.BlockSpec((TB, cols), lambda i: (i, 0))

    def resident_spec(shape):
        return pl.BlockSpec(shape, lambda i: (0, 0))

    args = (xp,
            w1b, b1f.reshape(1, H1),
            w2b, b2f.reshape(1, H2),
            w3b, b3p.reshape(1, Cp))

    cost = pl.CostEstimate(
        flops=2 * Bp * (D * H1 + H1 * H2 + H2 * Cp),
        transcendentals=0,
        bytes_accessed=(Bp * D * ELEM_W
                        + (D * H1 + H1 * H2 + H2 * Cp) * ELEM_W
                        + (H1 + H2 + Cp) * 4
                        + Bp * Cp * 4),
    )

    out = pl.pallas_call(
        mlp_kernel,
        grid=grid,
        in_specs=[row_spec(D)] + [resident_spec(a.shape) for a in args[1:]],
        out_specs=pl.BlockSpec((TB, Cp), lambda i: (i, 0)),
        out_shape=jax.ShapeDtypeStruct((Bp, Cp), jnp.float32),
        compiler_params=pltpu.CompilerParams(
            dimension_semantics=("parallel",),
            vmem_limit_bytes=vmem_limit),
        cost_estimate=cost,
    )(*args)

    return out[:B, :C]


def ref_forward(x, params):
    """Pure-JAX f32 replica of the torch eval-mode forward."""
    (w1, b1, g1, be1, m1, v1,
     w2, b2, g2, be2, m2, v2,
     w3, b3) = params
    h = x @ w1 + b1
    h = g1 * (h - m1) / jnp.sqrt(v1 + BN_EPS) + be1
    h = jnp.maximum(h, 0.0)
    h = h @ w2 + b2
    h = g2 * (h - m2) / jnp.sqrt(v2 + BN_EPS) + be2
    h = jnp.maximum(h, 0.0)
    return h @ w3 + b3


def ref_forward_bf16path(x, params):
    """Reference that mirrors the kernel's mixed-precision path exactly."""
    (w1, b1, g1, be1, m1, v1,
     w2, b2, g2, be2, m2, v2,
     w3, b3) = params
    w1f, b1f = _fold_bn(w1, b1, g1, be1, m1, v1)
    w2f, b2f = _fold_bn(w2, b2, g2, be2, m2, v2)
    bf16 = jnp.bfloat16
    h = jnp.dot(x.astype(bf16), w1f.astype(bf16),
                preferred_element_type=jnp.float32) + b1f
    h = jnp.maximum(h, 0.0).astype(bf16)
    h = jnp.dot(h, w2f.astype(bf16),
                preferred_element_type=jnp.float32) + b2f
    h = jnp.maximum(h, 0.0).astype(bf16)
    return jnp.dot(h, w3.astype(bf16),
                   preferred_element_type=jnp.float32) + b3


def init_params(key, input_dim, num_classes):
    """Deterministic nn.Linear-style init; weights stored as (in, out).
    BatchNorm running stats / affine params are randomized to make the
    BN-fold verification non-trivial."""
    ks = jax.random.split(key, 14)

    def lin(kw, kb, fan_in, fan_out):
        bound = 1.0 / (fan_in ** 0.5)
        w = jax.random.uniform(kw, (fan_in, fan_out), jnp.float32, -bound, bound)
        b = jax.random.uniform(kb, (fan_out,), jnp.float32, -bound, bound)
        return w, b

    def bn(kg, kb, km, kv, n):
        gamma = jax.random.uniform(kg, (n,), jnp.float32, 0.5, 1.5)
        beta = 0.1 * jax.random.normal(kb, (n,), jnp.float32)
        mean = 0.1 * jax.random.normal(km, (n,), jnp.float32)
        var = jax.random.uniform(kv, (n,), jnp.float32, 0.5, 1.5)
        return gamma, beta, mean, var

    w1, b1 = lin(ks[0], ks[1], input_dim, H1)
    g1, be1, m1, v1 = bn(ks[2], ks[3], ks[4], ks[5], H1)
    w2, b2 = lin(ks[6], ks[7], H1, H2)
    g2, be2, m2, v2 = bn(ks[8], ks[9], ks[10], ks[11], H2)
    w3, b3 = lin(ks[12], ks[13], H2, num_classes)
    return (w1, b1, g1, be1, m1, v1,
            w2, b2, g2, be2, m2, v2,
            w3, b3)


if __name__ == "__main__":
    B, D, C = 8, 32, 10
    key = jax.random.PRNGKey(0)
    k_param, k_x = jax.random.split(key)
    params = init_params(k_param, D, C)
    x = jax.random.normal(k_x, (B, D), jnp.float32)

    out = simplified_cnn_path(x, params)
    out = jax.block_until_ready(out)
    assert out.shape == (B, C)

    # Tight check against a reference that mirrors the kernel's bf16/f32 path.
    out_ref_mixed = ref_forward_bf16path(x, params)
    assert jnp.allclose(out, out_ref_mixed, atol=2e-3, rtol=2e-3), (
        float(jnp.max(jnp.abs(out - out_ref_mixed))))

    # Looser check against the full-f32 module semantics (bf16 input rounding).
    out_ref_f32 = ref_forward(x, params)
    assert jnp.allclose(out, out_ref_f32, atol=6e-2, rtol=6e-2), (
        float(jnp.max(jnp.abs(out - out_ref_f32))))

    print("KERNEL_OK")
</pallas_src>

<mosaic_0001>
module attributes {stable_mosaic.version = 11 : i64} {
  func.func @mlp_kernel(%arg0: i32, %arg1: memref<16x32xbf16, #tpu.memory_space<vmem>>, %arg2: memref<32x128xbf16, #tpu.memory_space<vmem>>, %arg3: memref<1x128xf32, #tpu.memory_space<vmem>>, %arg4: memref<128x64xbf16, #tpu.memory_space<vmem>>, %arg5: memref<1x64xf32, #tpu.memory_space<vmem>>, %arg6: memref<64x128xbf16, #tpu.memory_space<vmem>>, %arg7: memref<1x128xf32, #tpu.memory_space<vmem>>, %arg8: memref<16x128xf32, #tpu.memory_space<vmem>>) attributes {dimension_semantics = [#tpu.dimension_semantics<parallel>], iteration_bounds = array<i64: 1>, scalar_prefetch = 0 : i64, scratch_operands = 0 : i64, tpu.core_type = #tpu.core_type<tc>, window_params = [{transform_indices = @transform_0, window_bounds = array<i64: 16, 32>}, {pipeline_mode = #tpu.pipeline_mode<synchronous>, transform_indices = @transform_1, window_bounds = array<i64: 32, 128>}, {pipeline_mode = #tpu.pipeline_mode<synchronous>, transform_indices = @transform_2, window_bounds = array<i64: 1, 128>}, {pipeline_mode = #tpu.pipeline_mode<synchronous>, transform_indices = @transform_3, window_bounds = array<i64: 128, 64>}, {pipeline_mode = #tpu.pipeline_mode<synchronous>, transform_indices = @transform_4, window_bounds = array<i64: 1, 64>}, {pipeline_mode = #tpu.pipeline_mode<synchronous>, transform_indices = @transform_5, window_bounds = array<i64: 64, 128>}, {pipeline_mode = #tpu.pipeline_mode<synchronous>, transform_indices = @transform_6, window_bounds = array<i64: 1, 128>}, {transform_indices = @transform_7, window_bounds = array<i64: 16, 128>}]} {
    %c0 = arith.constant 0 : index
    %c0_0 = arith.constant 0 : index
    %0 = vector.load %arg1[%c0, %c0_0] : memref<16x32xbf16, #tpu.memory_space<vmem>>, vector<16x32xbf16>
    %c0_1 = arith.constant 0 : index
    %c0_2 = arith.constant 0 : index
    %1 = vector.load %arg2[%c0_1, %c0_2] : memref<32x128xbf16, #tpu.memory_space<vmem>>, vector<32x128xbf16>
    %cst = arith.constant dense<0.000000e+00> : vector<16x128xf32>
    %2 = tpu.matmul %0, %1, %cst {dimension_numbers = #tpu.dot_dimension_numbers<[1], [0], [0], [1], [0, 0, 1, 1], [], []>} : vector<16x32xbf16>, vector<32x128xbf16>, vector<16x128xf32> -> vector<16x128xf32>
    %c0_3 = arith.constant 0 : index
    %c0_4 = arith.constant 0 : index
    %3 = vector.load %arg3[%c0_3, %c0_4] : memref<1x128xf32, #tpu.memory_space<vmem>>, vector<1x128xf32>
    %4 = vector.broadcast %3 : vector<1x128xf32> to vector<16x128xf32>
    %5 = arith.addf %2, %4 : vector<16x128xf32>
    %cst_5 = arith.constant 0.000000e+00 : f32
    %6 = vector.broadcast %cst_5 : f32 to vector<16x128xf32>
    %7 = arith.maximumf %5, %6 : vector<16x128xf32>
    %8 = arith.truncf %7 : vector<16x128xf32> to vector<16x128xbf16>
    %c0_6 = arith.constant 0 : index
    %c0_7 = arith.constant 0 : index
    %9 = vector.load %arg4[%c0_6, %c0_7] : memref<128x64xbf16, #tpu.memory_space<vmem>>, vector<128x64xbf16>
    %cst_8 = arith.constant dense<0.000000e+00> : vector<16x64xf32>
    %10 = tpu.matmul %8, %9, %cst_8 {dimension_numbers = #tpu.dot_dimension_numbers<[1], [0], [0], [1], [0, 0, 1, 1], [], []>} : vector<16x128xbf16>, vector<128x64xbf16>, vector<16x64xf32> -> vector<16x64xf32>
    %c0_9 = arith.constant 0 : index
    %c0_10 = arith.constant 0 : index
    %11 = vector.load %arg5[%c0_9, %c0_10] : memref<1x64xf32, #tpu.memory_space<vmem>>, vector<1x64xf32>
    %12 = vector.broadcast %11 : vector<1x64xf32> to vector<16x64xf32>
    %13 = arith.addf %10, %12 : vector<16x64xf32>
    %cst_11 = arith.constant 0.000000e+00 : f32
    %14 = vector.broadcast %cst_11 : f32 to vector<16x64xf32>
    %15 = arith.maximumf %13, %14 : vector<16x64xf32>
    %16 = arith.truncf %15 : vector<16x64xf32> to vector<16x64xbf16>
    %c0_12 = arith.constant 0 : index
    %c0_13 = arith.constant 0 : index
    %17 = vector.load %arg6[%c0_12, %c0_13] : memref<64x128xbf16, #tpu.memory_space<vmem>>, vector<64x128xbf16>
    %cst_14 = arith.constant dense<0.000000e+00> : vector<16x128xf32>
    %18 = tpu.matmul %16, %17, %cst_14 {dimension_numbers = #tpu.dot_dimension_numbers<[1], [0], [0], [1], [0, 0, 1, 1], [], []>} : vector<16x64xbf16>, vector<64x128xbf16>, vector<16x128xf32> -> vector<16x128xf32>
    %c0_15 = arith.constant 0 : index
    %c0_16 = arith.constant 0 : index
    %19 = vector.load %arg7[%c0_15, %c0_16] : memref<1x128xf32, #tpu.memory_space<vmem>>, vector<1x128xf32>
    %20 = vector.broadcast %19 : vector<1x128xf32> to vector<16x128xf32>
    %21 = arith.addf %18, %20 : vector<16x128xf32>
    %c0_17 = arith.constant 0 : index
    %c0_18 = arith.constant 0 : index
    %22 = vector.load %arg8[%c0_17, %c0_18] : memref<16x128xf32, #tpu.memory_space<vmem>>, vector<16x128xf32>
    tpu.vector_store %arg8[%c0_17, %c0_18], %21 {strides = array<i32>} : memref<16x128xf32, #tpu.memory_space<vmem>>, vector<16x128xf32>,
    return
  }
  func.func @transform_0(%arg0: i32) -> (i32, i32) {
    %c0_i32 = arith.constant 0 : i32
    %c0_i32_0 = arith.constant 0 : i32
    return %arg0, %c0_i32 : i32, i32
  }
  func.func @transform_1(%arg0: i32) -> (i32, i32) {
    %c0_i32 = arith.constant 0 : i32
    %c0_i32_0 = arith.constant 0 : i32
    %c0_i32_1 = arith.constant 0 : i32
    return %c0_i32, %c0_i32_0 : i32, i32
  }
  func.func @transform_2(%arg0: i32) -> (i32, i32) {
    %c0_i32 = arith.constant 0 : i32
    %c0_i32_0 = arith.constant 0 : i32
    %c0_i32_1 = arith.constant 0 : i32
    return %c0_i32, %c0_i32_0 : i32, i32
  }
  func.func @transform_3(%arg0: i32) -> (i32, i32) {
    %c0_i32 = arith.constant 0 : i32
    %c0_i32_0 = arith.constant 0 : i32
    %c0_i32_1 = arith.constant 0 : i32
    return %c0_i32, %c0_i32_0 : i32, i32
  }
  func.func @transform_4(%arg0: i32) -> (i32, i32) {
    %c0_i32 = arith.constant 0 : i32
    %c0_i32_0 = arith.constant 0 : i32
    %c0_i32_1 = arith.constant 0 : i32
    return %c0_i32, %c0_i32_0 : i32, i32
  }
  func.func @transform_5(%arg0: i32) -> (i32, i32) {
    %c0_i32 = arith.constant 0 : i32
    %c0_i32_0 = arith.constant 0 : i32
    %c0_i32_1 = arith.constant 0 : i32
    return %c0_i32, %c0_i32_0 : i32, i32
  }
  func.func @transform_6(%arg0: i32) -> (i32, i32) {
    %c0_i32 = arith.constant 0 : i32
    %c0_i32_0 = arith.constant 0 : i32
    %c0_i32_1 = arith.constant 0 : i32
    return %c0_i32, %c0_i32_0 : i32, i32
  }
  func.func @transform_7(%arg0: i32) -> (i32, i32) {
    %c0_i32 = arith.constant 0 : i32
    %c0_i32_0 = arith.constant 0 : i32
    return %arg0, %c0_i32 : i32, i32
  }
}

</mosaic_0001>

<bundles_post_ra>
// kernel: tpu_custom_call.1
= control target key start
LH: loop header
LB: loop body
LE: loop exit
PB: predicated region body
PF: predicated region fallthrough
CT: control target
= control target key end

     0   :  { %v442_v1 = vmov 0.0   ;;  %vm443_vm0 = vmmov 0   ;;  %vm58_vm1 = vcmask 261120   ;;  %s547_s0 = inlined_call_operand.vmem [shape: bf16[16,32], index: 0, kind: input, shape index: {}]   ;;  %s548_s1 = inlined_call_operand.vmem [shape: bf16[32,128], index: 1, kind: input, shape index: {}]   ;;  %s549_s2 = inlined_call_operand.vmem [shape: f32[1,128], index: 2, kind: input, shape index: {}]   ;;  %s550_s3 = inlined_call_operand.vmem [shape: bf16[128,64], index: 3, kind: input, shape index: {}]   ;;  %s551_s4 = inlined_call_operand.vmem [shape: f32[1,64], index: 4, kind: input, shape index: {}]   ;;  %s552_s5 = inlined_call_operand.vmem [shape: bf16[64,128], index: 5, kind: input, shape index: {}]   ;;  %s553_s6 = inlined_call_operand.vmem [shape: f32[1,128], index: 6, kind: input, shape index: {}]   ;;  %s554_s7 = inlined_call_operand.hbm [shape: f32[16,128], index: 7, kind: output, shape index: {}]  }
   0x1   :  { %v405_v0 = vld [vmem:[%s548_s1 + $0x8] sm:$0xff]   ;;  %360 = vmatprep.subr.bf16.mxu0 %v442_v1  ;;  %368 = vmatprep.subr.bf16.mxu1 %v442_v1  ;;  %v406_v2 = vld [vmem:[%s548_s1] sm:$0xff]   ;;  %v408_v3 = vld [vmem:[%s550_s3 + $0x38] sm:$0xff]  }
   0x2   :  { %361 = vmatpush3.bf16.msra.mxu0 %v405_v0  ;;  %364 = vmatprep.mubr.msk.bf16.mxu0 %vm443_vm0, %v442_v1  ;;  %v407_v4 = vld [vmem:[%s547_s0] sm:$0xff]   ;;  %v409_v5 = vld [vmem:[%s550_s3 + $0x30] sm:$0xff]   ;;  %v410_v6 = vld [vmem:[%s550_s3 + $0x28] sm:$0xff]  }
   0x3   :  { %362 = vmatprep.subr.bf16.mxu0 %v442_v1  ;;  %384 = vmatprep.mubr.msk.bf16.mxu1 %vm443_vm0, %v442_v1  ;;  %v411_v7 = vld [vmem:[%s550_s3 + $0x20] sm:$0xff]  }
   0x4   :  { %369 = vmatpush3.bf16.msra.mxu1 %v408_v3 }
   0x5   :  { %370 = vmatprep.subr.bf16.mxu1 %v442_v1 }
   0x6   :  { %363 = vmatpush3.bf16.msra.mxu0 %v406_v2 }
   0x7   :  { %388 = vmatprep.subr.bf16.mxu0 %v442_v1 }
   0x8   :  { %371 = vmatpush3.bf16.msra.mxu1 %v409_v5 }
   0x9   :  { %365 = vmatmul.mubr.msk.bf16.vlgmr.msra.gmra.mxu0 %vm58_vm1, %v407_v4  ;;  %372 = vmatprep.subr.bf16.mxu1 %v442_v1 }
   0xa   :  { %396 = vmatprep.mubr.msk.bf16.mxu0 %vm443_vm0, %v442_v1 }
   0xc   :  { %373 = vmatpush3.bf16.msra.mxu1 %v410_v6 }
   0xd   :  { %12 = vsyncpa [#allocation3], 0  ;;  %374 = vmatprep.subr.bf16.mxu1 %v442_v1  ;;  %v412_v8 = vld [vmem:[%s550_s3 + $0x18] sm:$0xff]   ;;  %v413_v9 = vld [vmem:[%s550_s3 + $0x10] sm:$0xff]   ;;  %vm260_vm2 = vcmask 523264  }
   0xe   :  { %v414_v10 = vld [vmem:[%s550_s3 + $0x8] sm:$0xff]   ;;  %v415_v11 = vld [vmem:[%s550_s3] sm:$0xff]   ;;  %v416_v12 = vld [vmem:[%s552_s5 + $0x18] sm:$0xff]  }
   0xf   :  { %389 = vmatpush3.bf16.msra.mxu0 %v416_v12  ;;  %v323_v13 = vld [vmem:[%s549_s2] ss:$0 sm:$0xff]  ;;  %v417_v23 = vld [vmem:[%s552_s5 + $0x10] sm:$0xff]   ;;  %v418_v24 = vld [vmem:[%s552_s5 + $0x8] sm:$0xff]  }
  0x10   :  { %375 = vmatpush3.bf16.msra.mxu1 %v411_v7  ;;  %390 = vmatprep.subr.bf16.mxu0 %v442_v1  ;;  %v419_v25 = vld [vmem:[%s552_s5] sm:$0xff]   ;;  %s444_s5 = smov [#allocation2]  }
  0x11   :  { %376 = vmatprep.subr.bf16.mxu1 %v442_v1  ;;  %v328_v26 = vld [vmem:[%s551_s4] ss:$0 sm:$0xff]  ;;  %s312_s10 = sshll.u32 %s444_s5, 4  ;;  %s313_s10 = int_to_ptr.vmem [resolvable:$true] %s312_s10 }
  0x12   :  { %v337_v36 = vld [vmem:[%s553_s6] ss:$0 sm:$0xff]  ;;  %s420_s4 = scalar_lea.vmem %s313_s10, 256  ;;  %p425_p1 = scmp.lt.s32.totalorder %s313_s10, %s313_s10 }
  0x13   :  { %391 = vmatpush3.bf16.msra.mxu0 %v417_v23  ;;  %p421_p0 = scmp.ne.s32.totalorder %s313_s10, %s420_s4  ;;  %p426_p2 = scmp.lt.s32.totalorder %s420_s4, %s420_s4 }
  0x14   :  { %377 = vmatpush3.bf16.msra.mxu1 %v412_v8  ;;  %392 = vmatprep.subr.bf16.mxu0 %v442_v1 }
  0x15   :  { %378 = vmatprep.subr.bf16.mxu1 %v442_v1  ;;  %p427_p3 = por %p426_p2, %p425_p1 }
  0x17   :  { %393 = vmatpush3.bf16.msra.mxu0 %v418_v24  ;;  %p428_p4 = pnand %p427_p3, %p421_p0 }
  0x18   :  { %379 = vmatpush3.bf16.msra.mxu1 %v413_v9  ;;  %394 = vmatprep.subr.bf16.mxu0 %v442_v1 }
  0x19   :  { %380 = vmatprep.subr.bf16.mxu1 %v442_v1 }
  0x1b   :  { %395 = vmatpush3.bf16.msra.mxu0 %v419_v25 }
  0x1c   :  { %381 = vmatpush3.bf16.msra.mxu1 %v414_v10 }
  0x1d   :  { %382 = vmatprep.subr.bf16.mxu1 %v442_v1 }
  0x20   :  { %383 = vmatpush3.bf16.msra.mxu1 %v415_v11 }
  0xc9   :  { %v96_v14 = vpop.f32.mrf.mxu0 }
  0xca   :  { %v97_v16 = vadd.f32 %v323_v13, %v96_v14 }
  0xcb   :  { %v366_v15 = vpop.f32.mrf.mxu0 }
  0xcc   :  { %v103_v20 = vmax.f32 %v97_v16, 0.0 }
  0xcd   :  { %v99_v17 = vpop.f32.mrf.mxu0 }
  0xce   :  { %v100_v18 = vadd.f32 %v323_v13, %v99_v17 }
  0xcf   :  { %v367_v19 = vpop.f32.mrf.mxu0 }
  0xd0   :  { %v104_v21 = vmax.f32 %v100_v18, 0.0 }
  0xd2   :  { %v105_v22 = vpack.c.bf16 %v104_v21, %v103_v20 }
  0xd4   :  { %385 = vmatmul.mubr.bf16.vlgmr.msra.gmra.mxu1 %v105_v22 }
 0x194   :  { %v211_v27 = vpop.f32.mrf.mxu1 }
 0x195   :  { %v212_v29 = vadd.f32 %v328_v26, %v211_v27 }
 0x196   :  { %v386_v28 = vpop.f32.mrf.mxu1 }
 0x197   :  { %v218_v33 = vmax.f32 %v212_v29, 0.0 }
 0x198   :  { %v214_v30 = vpop.f32.mrf.mxu1 }
 0x199   :  { %v215_v31 = vadd.f32 %v328_v26, %v214_v30 }
 0x19a   :  { %v387_v32 = vpop.f32.mrf.mxu1 }
 0x19b   :  { %v219_v34 = vmax.f32 %v215_v31, 0.0 }
 0x19d   :  { %v220_v35 = vpack.c.bf16 %v219_v34, %v218_v33 }
 0x19f   :  { %397 = vmatmul.mubr.msk.bf16.vlgmr.msra.gmra.mxu0 %vm260_vm2, %v220_v35 }
 0x25f   :  { %v298_v37 = vpop.f32.mrf.mxu0 }
 0x260   :  { %v299_v38 = vadd.f32 %v337_v36, %v298_v37 }
 0x261   :  { %v398_v39 = vpop.f32.mrf.mxu0 }
 0x262   :  { %305 = vst [vmem:[#allocation2] sm:$0xff] %v299_v38 }
 0x263   :  { %v301_v40 = vpop.f32.mrf.mxu0 }
 0x264   :  { %v302_v41 = vadd.f32 %v337_v36, %v301_v40 }
 0x265   :  { %v399_v42 = vpop.f32.mrf.mxu0 }
 0x266   :  { %306 = vst [vmem:[#allocation2 + $0x8] sm:$0xff] %v302_v41 }
 0x267   :  { %431 = shalt.err (!%p428_p4)
}
 0x268   :  { %s445_s1 = smov 128   ;;  %s446_s6 = smov 8  }
 0x269   :  { %318 = dma.vmem_to_hbm [thread:$0]  %s313_s10, 256, %s554_s7, [#allocation3], %s445_s1, %s445_s1, %s446_s6  }
 0x26a   :  { %440 = dma.done.wait [#allocation3], 256  }
 0x26b   :  { %441 = vsyncadd [#allocation3], 4294967040 }
 0x26c   :  { %322 = vsyncpa [#allocation3], 1 }

</bundles_post_ra>
